<compile_context>
chip_gen: v7x
topology: tpu7x:2x2x1
jax: 0.10.0
libtpu: 0.0.40
codegen_flags: <defaults>
</compile_context>

<pallas_src>
import jax
import jax.numpy as jnp
from jax.experimental import pallas as pl
from jax.experimental.pallas import tpu as pltpu

_VMEM_LIMIT = 32 * 1024 * 1024   # explicit scoped-VMEM budget (safe on v5e/v6e/v7x)
_CONV_TILE_M = 2048              # lanes per conv output tile
_FC_TILE_B = 512                 # batch rows per FC tile


# ------------------------------ Pallas kernels ------------------------------


def _conv_pool_kernel(cols_ref, w_ref, b_ref, o_ref):
    """Fused conv-as-matmul + bias + ReLU + 2x2 max-pool (transposed layout).

    cols_ref: (4, K, TM)  bf16 -- im2col patches, leading axis = pool window pos
    w_ref:    (Cout, K)   bf16 -- conv weight, K ordered (Cin, kh, kw)
    b_ref:    (Cout, 1)   f32
    o_ref:    (Cout, TM)  f32  -- pooled activation, M = N*Hp*Wp (lane dim)
    """
    w = w_ref[...]
    p = jnp.dot(w, cols_ref[0], preferred_element_type=jnp.float32)
    for a in range(1, 4):
        p = jnp.maximum(
            p, jnp.dot(w, cols_ref[a], preferred_element_type=jnp.float32))
    # bias is constant over the pool window and ReLU is monotone, so
    # relu(max(conv) + b) == maxpool(relu(conv + b)).
    o_ref[...] = jnp.maximum(p + b_ref[...], 0.0)


def _fc_chain_kernel(x_ref, w1_ref, b1_ref, w2_ref, b2_ref, w3_ref, b3_ref,
                     o_ref):
    """Fused fc1+ReLU -> fc2+ReLU -> fc3.  All weights resident in VMEM."""
    h = jnp.dot(x_ref[...], w1_ref[...], preferred_element_type=jnp.float32)
    h = jnp.maximum(h + b1_ref[...], 0.0)
    h = jnp.dot(h.astype(jnp.bfloat16), w2_ref[...],
                preferred_element_type=jnp.float32)
    h = jnp.maximum(h + b2_ref[...], 0.0)
    o_ref[...] = (jnp.dot(h.astype(jnp.bfloat16), w3_ref[...],
                          preferred_element_type=jnp.float32) + b3_ref[...])


# ------------------------------ kernel wrappers ------------------------------


def _conv_pool_call(cols, w, b):
    """cols: (4, K, M) bf16, w: (Cout, K) bf16, b: (Cout, 1) f32 -> (Cout, M) f32."""
    _, K, M = cols.shape
    Cout = w.shape[0]
    tm = M if M <= _CONV_TILE_M else _CONV_TILE_M
    return pl.pallas_call(
        _conv_pool_kernel,
        out_shape=jax.ShapeDtypeStruct((Cout, M), jnp.float32),
        grid=(pl.cdiv(M, tm),),
        in_specs=[
            pl.BlockSpec((4, K, tm), lambda i: (0, 0, i)),
            pl.BlockSpec((Cout, K), lambda i: (0, 0)),
            pl.BlockSpec((Cout, 1), lambda i: (0, 0)),
        ],
        out_specs=pl.BlockSpec((Cout, tm), lambda i: (0, i)),
        compiler_params=pltpu.CompilerParams(
            dimension_semantics=("parallel",),
            vmem_limit_bytes=_VMEM_LIMIT),
    )(cols, w, b)


def _fc_chain_call(x, w1, b1, w2, b2, w3, b3):
    """x: (N, 400) bf16; weights (in,out) bf16; biases (1,out) f32 -> (N, 10) f32."""
    N, K = x.shape
    Nout = w3.shape[1]
    tb = N if N <= _FC_TILE_B else _FC_TILE_B
    return pl.pallas_call(
        _fc_chain_kernel,
        out_shape=jax.ShapeDtypeStruct((N, Nout), jnp.float32),
        grid=(pl.cdiv(N, tb),),
        in_specs=[
            pl.BlockSpec((tb, K), lambda i: (i, 0)),
            pl.BlockSpec(w1.shape, lambda i: (0, 0)),
            pl.BlockSpec(b1.shape, lambda i: (0, 0)),
            pl.BlockSpec(w2.shape, lambda i: (0, 0)),
            pl.BlockSpec(b2.shape, lambda i: (0, 0)),
            pl.BlockSpec(w3.shape, lambda i: (0, 0)),
            pl.BlockSpec(b3.shape, lambda i: (0, 0)),
        ],
        out_specs=pl.BlockSpec((tb, Nout), lambda i: (i, 0)),
        compiler_params=pltpu.CompilerParams(
            dimension_semantics=("parallel",),
            vmem_limit_bytes=_VMEM_LIMIT),
    )(x, w1, b1, w2, b2, w3, b3)


# ----------------------- im2col + pool-window glue ---------------------------


def _pool_patches(act_cf, kh, kw):
    """Strided im2col fused with the 2x2 pool-window gather (XLA glue).

    act_cf: (Cin, N, H, W) channel-first activation.
    Returns (4, Cin*kh*kw, N*Hp*Wp):
      axis 0: 2x2 max-pool window position (row-major)
      axis 1: patch features ordered (Cin, kh, kw)  -- PyTorch weight order
      axis 2: pooled output pixels ordered (n, io, jo) -- matmul lane dim
    """
    Cin, N, H, W = act_cf.shape
    Ho, Wo = H - kh + 1, W - kw + 1
    Hp, Wp = Ho // 2, Wo // 2      # valid conv, then 2x2 / stride-2 pool (floor)
    wins = []
    for a in range(2):
        for bb in range(2):
            taps = []
            for di in range(kh):
                for dj in range(kw):
                    taps.append(act_cf[:, :,
                                       a + di: a + di + 2 * Hp: 2,
                                       bb + dj: bb + dj + 2 * Wp: 2])
            t = jnp.stack(taps, axis=1)                # (Cin, kh*kw, N, Hp, Wp)
            wins.append(t.reshape(Cin * kh * kw, N * Hp * Wp))
    return jnp.stack(wins, axis=0)


def conv_relu_pool(act_cf, w, b, kh, kw):
    """relu(maxpool2x2(conv2d_valid(act, w) + b)) via one fused Pallas kernel.

    act_cf: (Cin, N, H, W) f32; w: (Cout, Cin*kh*kw) bf16; b: (Cout, 1) f32.
    Returns the channel-first pooled activation (Cout, N, Hp, Wp) f32.
    """
    Cin, N, H, W = act_cf.shape
    Cout = w.shape[0]
    Hp, Wp = (H - kh + 1) // 2, (W - kw + 1) // 2
    # TODO(synk): move the patch gather in-kernel (strided pl.ds loads +
    # shifted-matmul accumulation) to avoid materializing im2col in HBM.
    cols = _pool_patches(act_cf, kh, kw).astype(jnp.bfloat16)
    out = _conv_pool_call(cols, w, b)                  # (Cout, N*Hp*Wp)
    return out.reshape(Cout, N, Hp, Wp)


# -------------------------------- parameters ---------------------------------


def init_params(key):
    """PyTorch-default-style init (uniform +/- 1/sqrt(fan_in)), torch layout, f32."""
    ks = jax.random.split(key, 10)

    def u(k, shape, fan_in):
        bound = 1.0 / jnp.sqrt(float(fan_in))
        return jax.random.uniform(k, shape, jnp.float32, -bound, bound)

    return {
        "conv1_w": u(ks[0], (6, 1, 5, 5), 25),
        "conv1_b": u(ks[1], (6,), 25),
        "conv2_w": u(ks[2], (16, 6, 5, 5), 150),
        "conv2_b": u(ks[3], (16,), 150),
        "fc1_w": u(ks[4], (128, 400), 400),
        "fc1_b": u(ks[5], (128,), 400),
        "fc2_w": u(ks[6], (54, 128), 128),
        "fc2_b": u(ks[7], (54,), 128),
        "fc3_w": u(ks[8], (10, 54), 54),
        "fc3_b": u(ks[9], (10,), 54),
    }


def prepare_params(p):
    """One-time layout prep: matmul operands -> (Cout,K) / (in,out) bf16;
    biases stay f32, pre-shaped for in-kernel broadcast."""
    f32, bf16 = jnp.float32, jnp.bfloat16
    return {
        "conv1_w": p["conv1_w"].reshape(6, 25).astype(bf16),
        "conv1_b": p["conv1_b"].reshape(6, 1).astype(f32),
        "conv2_w": p["conv2_w"].reshape(16, 150).astype(bf16),
        "conv2_b": p["conv2_b"].reshape(16, 1).astype(f32),
        "fc1_w": p["fc1_w"].T.astype(bf16),        # (400, 128)
        "fc1_b": p["fc1_b"].reshape(1, 128).astype(f32),
        "fc2_w": p["fc2_w"].T.astype(bf16),        # (128, 54)
        "fc2_b": p["fc2_b"].reshape(1, 54).astype(f32),
        "fc3_w": p["fc3_w"].T.astype(bf16),        # (54, 10)
        "fc3_b": p["fc3_b"].reshape(1, 10).astype(f32),
    }


# --------------------------------- forward -----------------------------------


def net_forward(prep, x_nchw):
    """Forward pass of `Net`: NCHW f32 input (N, 1, 32, 32) -> logits (N, 10)."""
    N = x_nchw.shape[0]
    act = jnp.transpose(x_nchw, (1, 0, 2, 3))                      # (1, N, 32, 32)
    act = conv_relu_pool(act, prep["conv1_w"], prep["conv1_b"], 5, 5)  # (6, N, 14, 14)
    act = conv_relu_pool(act, prep["conv2_w"], prep["conv2_b"], 5, 5)  # (16, N, 5, 5)
    # PyTorch flatten order (C, H, W): the channel-major conv output already
    # gives it per sample; only a tiny (C, N, H*W) -> (N, C, H*W) transpose.
    C2, _, H2, W2 = act.shape
    xf = jnp.transpose(act.reshape(C2, N, H2 * W2), (1, 0, 2)).reshape(N, C2 * H2 * W2)
    return _fc_chain_call(xf.astype(jnp.bfloat16),
                          prep["fc1_w"], prep["fc1_b"],
                          prep["fc2_w"], prep["fc2_b"],
                          prep["fc3_w"], prep["fc3_b"])


# ----------------------------------- main -------------------------------------


if __name__ == "__main__":
    key = jax.random.PRNGKey(0)
    pkey, xkey = jax.random.split(key)
    params = init_params(pkey)
    prep = prepare_params(params)
    # Input implied by the module: 1 channel, 32x32 spatial (16*5*5 flat feats).
    x = jax.random.normal(xkey, (2, 1, 32, 32), dtype=jnp.float32)

    out = jax.block_until_ready(jax.jit(net_forward)(prep, x))
    assert out.shape == (2, 10), out.shape
    assert bool(jnp.all(jnp.isfinite(out)))
    print("KERNEL_OK")
</pallas_src>

<mosaic_0001>
module attributes {stable_mosaic.version = 11 : i64} {
  func.func @_conv_pool_kernel(%arg0: i32, %arg1: memref<4x25x392xbf16, #tpu.memory_space<vmem>>, %arg2: memref<6x25xbf16, #tpu.memory_space<vmem>>, %arg3: memref<6x1xf32, #tpu.memory_space<vmem>>, %arg4: memref<6x392xf32, #tpu.memory_space<vmem>>) attributes {dimension_semantics = [#tpu.dimension_semantics<parallel>], iteration_bounds = array<i64: 1>, scalar_prefetch = 0 : i64, scratch_operands = 0 : i64, tpu.core_type = #tpu.core_type<tc>, window_params = [{transform_indices = @transform_0, window_bounds = array<i64: 4, 25, 392>}, {pipeline_mode = #tpu.pipeline_mode<synchronous>, transform_indices = @transform_1, window_bounds = array<i64: 6, 25>}, {pipeline_mode = #tpu.pipeline_mode<synchronous>, transform_indices = @transform_2, window_bounds = array<i64: 6, 1>}, {transform_indices = @transform_3, window_bounds = array<i64: 6, 392>}]} {
    %c0 = arith.constant 0 : index
    %c0_0 = arith.constant 0 : index
    %0 = vector.load %arg2[%c0, %c0_0] : memref<6x25xbf16, #tpu.memory_space<vmem>>, vector<6x25xbf16>
    %c0_1 = arith.constant 0 : index
    %c0_2 = arith.constant 0 : index
    %c0_3 = arith.constant 0 : index
    %1 = vector.load %arg1[%c0_1, %c0_2, %c0_3] : memref<4x25x392xbf16, #tpu.memory_space<vmem>>, vector<1x25x392xbf16>
    %2 = vector.shape_cast %1 : vector<1x25x392xbf16> to vector<25x392xbf16>
    %cst = arith.constant dense<0.000000e+00> : vector<6x392xf32>
    %3 = tpu.matmul %0, %2, %cst {dimension_numbers = #tpu.dot_dimension_numbers<[1], [0], [0], [1], [0, 0, 1, 1], [], []>} : vector<6x25xbf16>, vector<25x392xbf16>, vector<6x392xf32> -> vector<6x392xf32>
    %c1 = arith.constant 1 : index
    %c0_4 = arith.constant 0 : index
    %c0_5 = arith.constant 0 : index
    %4 = vector.load %arg1[%c1, %c0_4, %c0_5] : memref<4x25x392xbf16, #tpu.memory_space<vmem>>, vector<1x25x392xbf16>
    %5 = vector.shape_cast %4 : vector<1x25x392xbf16> to vector<25x392xbf16>
    %cst_6 = arith.constant dense<0.000000e+00> : vector<6x392xf32>
    %6 = tpu.matmul %0, %5, %cst_6 {dimension_numbers = #tpu.dot_dimension_numbers<[1], [0], [0], [1], [0, 0, 1, 1], [], []>} : vector<6x25xbf16>, vector<25x392xbf16>, vector<6x392xf32> -> vector<6x392xf32>
    %7 = arith.maximumf %3, %6 : vector<6x392xf32>
    %c2 = arith.constant 2 : index
    %c0_7 = arith.constant 0 : index
    %c0_8 = arith.constant 0 : index
    %8 = vector.load %arg1[%c2, %c0_7, %c0_8] : memref<4x25x392xbf16, #tpu.memory_space<vmem>>, vector<1x25x392xbf16>
    %9 = vector.shape_cast %8 : vector<1x25x392xbf16> to vector<25x392xbf16>
    %cst_9 = arith.constant dense<0.000000e+00> : vector<6x392xf32>
    %10 = tpu.matmul %0, %9, %cst_9 {dimension_numbers = #tpu.dot_dimension_numbers<[1], [0], [0], [1], [0, 0, 1, 1], [], []>} : vector<6x25xbf16>, vector<25x392xbf16>, vector<6x392xf32> -> vector<6x392xf32>
    %11 = arith.maximumf %7, %10 : vector<6x392xf32>
    %c3 = arith.constant 3 : index
    %c0_10 = arith.constant 0 : index
    %c0_11 = arith.constant 0 : index
    %12 = vector.load %arg1[%c3, %c0_10, %c0_11] : memref<4x25x392xbf16, #tpu.memory_space<vmem>>, vector<1x25x392xbf16>
    %13 = vector.shape_cast %12 : vector<1x25x392xbf16> to vector<25x392xbf16>
    %cst_12 = arith.constant dense<0.000000e+00> : vector<6x392xf32>
    %14 = tpu.matmul %0, %13, %cst_12 {dimension_numbers = #tpu.dot_dimension_numbers<[1], [0], [0], [1], [0, 0, 1, 1], [], []>} : vector<6x25xbf16>, vector<25x392xbf16>, vector<6x392xf32> -> vector<6x392xf32>
    %15 = arith.maximumf %11, %14 : vector<6x392xf32>
    %c0_13 = arith.constant 0 : index
    %c0_14 = arith.constant 0 : index
    %16 = vector.load %arg3[%c0_13, %c0_14] : memref<6x1xf32, #tpu.memory_space<vmem>>, vector<6x1xf32>
    %17 = vector.broadcast %16 : vector<6x1xf32> to vector<6x392xf32>
    %18 = arith.addf %15, %17 : vector<6x392xf32>
    %cst_15 = arith.constant 0.000000e+00 : f32
    %19 = vector.broadcast %cst_15 : f32 to vector<6x392xf32>
    %20 = arith.maximumf %18, %19 : vector<6x392xf32>
    %c0_16 = arith.constant 0 : index
    %c0_17 = arith.constant 0 : index
    %21 = vector.load %arg4[%c0_16, %c0_17] : memref<6x392xf32, #tpu.memory_space<vmem>>, vector<6x392xf32>
    tpu.vector_store %arg4[%c0_16, %c0_17], %20 {strides = array<i32>} : memref<6x392xf32, #tpu.memory_space<vmem>>, vector<6x392xf32>,
    return
  }
  func.func @transform_0(%arg0: i32) -> (i32, i32, i32) {
    %c0_i32 = arith.constant 0 : i32
    %c0_i32_0 = arith.constant 0 : i32
    %c0_i32_1 = arith.constant 0 : i32
    return %c0_i32, %c0_i32_0, %arg0 : i32, i32, i32
  }
  func.func @transform_1(%arg0: i32) -> (i32, i32) {
    %c0_i32 = arith.constant 0 : i32
    %c0_i32_0 = arith.constant 0 : i32
    %c0_i32_1 = arith.constant 0 : i32
    return %c0_i32, %c0_i32_0 : i32, i32
  }
  func.func @transform_2(%arg0: i32) -> (i32, i32) {
    %c0_i32 = arith.constant 0 : i32
    %c0_i32_0 = arith.constant 0 : i32
    %c0_i32_1 = arith.constant 0 : i32
    return %c0_i32, %c0_i32_0 : i32, i32
  }
  func.func @transform_3(%arg0: i32) -> (i32, i32) {
    %c0_i32 = arith.constant 0 : i32
    %c0_i32_0 = arith.constant 0 : i32
    return %c0_i32, %arg0 : i32, i32
  }
}

module attributes {stable_mosaic.version = 11 : i64} {
  func.func @_conv_pool_kernel(%arg0: i32, %arg1: memref<4x150x50xbf16, #tpu.memory_space<vmem>>, %arg2: memref<16x150xbf16, #tpu.memory_space<vmem>>, %arg3: memref<16x1xf32, #tpu.memory_space<vmem>>, %arg4: memref<16x50xf32, #tpu.memory_space<vmem>>) attributes {dimension_semantics = [#tpu.dimension_semantics<parallel>], iteration_bounds = array<i64: 1>, scalar_prefetch = 0 : i64, scratch_operands = 0 : i64, tpu.core_type = #tpu.core_type<tc>, window_params = [{transform_indices = @transform_0, window_bounds = array<i64: 4, 150, 50>}, {pipeline_mode = #tpu.pipeline_mode<synchronous>, transform_indices = @transform_1, window_bounds = array<i64: 16, 150>}, {pipeline_mode = #tpu.pipeline_mode<synchronous>, transform_indices = @transform_2, window_bounds = array<i64: 16, 1>}, {transform_indices = @transform_3, window_bounds = array<i64: 16, 50>}]} {
    %c0 = arith.constant 0 : index
    %c0_0 = arith.constant 0 : index
    %0 = vector.load %arg2[%c0, %c0_0] : memref<16x150xbf16, #tpu.memory_space<vmem>>, vector<16x150xbf16>
    %c0_1 = arith.constant 0 : index
    %c0_2 = arith.constant 0 : index
    %c0_3 = arith.constant 0 : index
    %1 = vector.load %arg1[%c0_1, %c0_2, %c0_3] : memref<4x150x50xbf16, #tpu.memory_space<vmem>>, vector<1x150x50xbf16>
    %2 = vector.shape_cast %1 : vector<1x150x50xbf16> to vector<150x50xbf16>
    %cst = arith.constant dense<0.000000e+00> : vector<16x50xf32>
    %3 = tpu.matmul %0, %2, %cst {dimension_numbers = #tpu.dot_dimension_numbers<[1], [0], [0], [1], [0, 0, 1, 1], [], []>} : vector<16x150xbf16>, vector<150x50xbf16>, vector<16x50xf32> -> vector<16x50xf32>
    %c1 = arith.constant 1 : index
    %c0_4 = arith.constant 0 : index
    %c0_5 = arith.constant 0 : index
    %4 = vector.load %arg1[%c1, %c0_4, %c0_5] : memref<4x150x50xbf16, #tpu.memory_space<vmem>>, vector<1x150x50xbf16>
    %5 = vector.shape_cast %4 : vector<1x150x50xbf16> to vector<150x50xbf16>
    %cst_6 = arith.constant dense<0.000000e+00> : vector<16x50xf32>
    %6 = tpu.matmul %0, %5, %cst_6 {dimension_numbers = #tpu.dot_dimension_numbers<[1], [0], [0], [1], [0, 0, 1, 1], [], []>} : vector<16x150xbf16>, vector<150x50xbf16>, vector<16x50xf32> -> vector<16x50xf32>
    %7 = arith.maximumf %3, %6 : vector<16x50xf32>
    %c2 = arith.constant 2 : index
    %c0_7 = arith.constant 0 : index
    %c0_8 = arith.constant 0 : index
    %8 = vector.load %arg1[%c2, %c0_7, %c0_8] : memref<4x150x50xbf16, #tpu.memory_space<vmem>>, vector<1x150x50xbf16>
    %9 = vector.shape_cast %8 : vector<1x150x50xbf16> to vector<150x50xbf16>
    %cst_9 = arith.constant dense<0.000000e+00> : vector<16x50xf32>
    %10 = tpu.matmul %0, %9, %cst_9 {dimension_numbers = #tpu.dot_dimension_numbers<[1], [0], [0], [1], [0, 0, 1, 1], [], []>} : vector<16x150xbf16>, vector<150x50xbf16>, vector<16x50xf32> -> vector<16x50xf32>
    %11 = arith.maximumf %7, %10 : vector<16x50xf32>
    %c3 = arith.constant 3 : index
    %c0_10 = arith.constant 0 : index
    %c0_11 = arith.constant 0 : index
    %12 = vector.load %arg1[%c3, %c0_10, %c0_11] : memref<4x150x50xbf16, #tpu.memory_space<vmem>>, vector<1x150x50xbf16>
    %13 = vector.shape_cast %12 : vector<1x150x50xbf16> to vector<150x50xbf16>
    %cst_12 = arith.constant dense<0.000000e+00> : vector<16x50xf32>
    %14 = tpu.matmul %0, %13, %cst_12 {dimension_numbers = #tpu.dot_dimension_numbers<[1], [0], [0], [1], [0, 0, 1, 1], [], []>} : vector<16x150xbf16>, vector<150x50xbf16>, vector<16x50xf32> -> vector<16x50xf32>
    %15 = arith.maximumf %11, %14 : vector<16x50xf32>
    %c0_13 = arith.constant 0 : index
    %c0_14 = arith.constant 0 : index
    %16 = vector.load %arg3[%c0_13, %c0_14] : memref<16x1xf32, #tpu.memory_space<vmem>>, vector<16x1xf32>
    %17 = vector.broadcast %16 : vector<16x1xf32> to vector<16x50xf32>
    %18 = arith.addf %15, %17 : vector<16x50xf32>
    %cst_15 = arith.constant 0.000000e+00 : f32
    %19 = vector.broadcast %cst_15 : f32 to vector<16x50xf32>
    %20 = arith.maximumf %18, %19 : vector<16x50xf32>
    %c0_16 = arith.constant 0 : index
    %c0_17 = arith.constant 0 : index
    %21 = vector.load %arg4[%c0_16, %c0_17] : memref<16x50xf32, #tpu.memory_space<vmem>>, vector<16x50xf32>
    tpu.vector_store %arg4[%c0_16, %c0_17], %20 {strides = array<i32>} : memref<16x50xf32, #tpu.memory_space<vmem>>, vector<16x50xf32>,
    return
  }
  func.func @transform_0(%arg0: i32) -> (i32, i32, i32) {
    %c0_i32 = arith.constant 0 : i32
    %c0_i32_0 = arith.constant 0 : i32
    %c0_i32_1 = arith.constant 0 : i32
    return %c0_i32, %c0_i32_0, %arg0 : i32, i32, i32
  }
  func.func @transform_1(%arg0: i32) -> (i32, i32) {
    %c0_i32 = arith.constant 0 : i32
    %c0_i32_0 = arith.constant 0 : i32
    %c0_i32_1 = arith.constant 0 : i32
    return %c0_i32, %c0_i32_0 : i32, i32
  }
  func.func @transform_2(%arg0: i32) -> (i32, i32) {
    %c0_i32 = arith.constant 0 : i32
    %c0_i32_0 = arith.constant 0 : i32
    %c0_i32_1 = arith.constant 0 : i32
    return %c0_i32, %c0_i32_0 : i32, i32
  }
  func.func @transform_3(%arg0: i32) -> (i32, i32) {
    %c0_i32 = arith.constant 0 : i32
    %c0_i32_0 = arith.constant 0 : i32
    return %c0_i32, %arg0 : i32, i32
  }
}

module attributes {stable_mosaic.version = 11 : i64} {
  func.func @_fc_chain_kernel(%arg0: i32, %arg1: memref<2x400xbf16, #tpu.memory_space<vmem>>, %arg2: memref<400x128xbf16, #tpu.memory_space<vmem>>, %arg3: memref<1x128xf32, #tpu.memory_space<vmem>>, %arg4: memref<128x54xbf16, #tpu.memory_space<vmem>>, %arg5: memref<1x54xf32, #tpu.memory_space<vmem>>, %arg6: memref<54x10xbf16, #tpu.memory_space<vmem>>, %arg7: memref<1x10xf32, #tpu.memory_space<vmem>>, %arg8: memref<2x10xf32, #tpu.memory_space<vmem>>) attributes {dimension_semantics = [#tpu.dimension_semantics<parallel>], iteration_bounds = array<i64: 1>, scalar_prefetch = 0 : i64, scratch_operands = 0 : i64, tpu.core_type = #tpu.core_type<tc>, window_params = [{transform_indices = @transform_0, window_bounds = array<i64: 2, 400>}, {pipeline_mode = #tpu.pipeline_mode<synchronous>, transform_indices = @transform_1, window_bounds = array<i64: 400, 128>}, {pipeline_mode = #tpu.pipeline_mode<synchronous>, transform_indices = @transform_2, window_bounds = array<i64: 1, 128>}, {pipeline_mode = #tpu.pipeline_mode<synchronous>, transform_indices = @transform_3, window_bounds = array<i64: 128, 54>}, {pipeline_mode = #tpu.pipeline_mode<synchronous>, transform_indices = @transform_4, window_bounds = array<i64: 1, 54>}, {pipeline_mode = #tpu.pipeline_mode<synchronous>, transform_indices = @transform_5, window_bounds = array<i64: 54, 10>}, {pipeline_mode = #tpu.pipeline_mode<synchronous>, transform_indices = @transform_6, window_bounds = array<i64: 1, 10>}, {transform_indices = @transform_7, window_bounds = array<i64: 2, 10>}]} {
    %c0 = arith.constant 0 : index
    %c0_0 = arith.constant 0 : index
    %0 = vector.load %arg1[%c0, %c0_0] : memref<2x400xbf16, #tpu.memory_space<vmem>>, vector<2x400xbf16>
    %c0_1 = arith.constant 0 : index
    %c0_2 = arith.constant 0 : index
    %1 = vector.load %arg2[%c0_1, %c0_2] : memref<400x128xbf16, #tpu.memory_space<vmem>>, vector<400x128xbf16>
    %cst = arith.constant dense<0.000000e+00> : vector<2x128xf32>
    %2 = tpu.matmul %0, %1, %cst {dimension_numbers = #tpu.dot_dimension_numbers<[1], [0], [0], [1], [0, 0, 1, 1], [], []>} : vector<2x400xbf16>, vector<400x128xbf16>, vector<2x128xf32> -> vector<2x128xf32>
    %c0_3 = arith.constant 0 : index
    %c0_4 = arith.constant 0 : index
    %3 = vector.load %arg3[%c0_3, %c0_4] : memref<1x128xf32, #tpu.memory_space<vmem>>, vector<1x128xf32>
    %4 = vector.broadcast %3 : vector<1x128xf32> to vector<2x128xf32>
    %5 = arith.addf %2, %4 : vector<2x128xf32>
    %cst_5 = arith.constant 0.000000e+00 : f32
    %6 = vector.broadcast %cst_5 : f32 to vector<2x128xf32>
    %7 = arith.maximumf %5, %6 : vector<2x128xf32>
    %8 = arith.truncf %7 : vector<2x128xf32> to vector<2x128xbf16>
    %c0_6 = arith.constant 0 : index
    %c0_7 = arith.constant 0 : index
    %9 = vector.load %arg4[%c0_6, %c0_7] : memref<128x54xbf16, #tpu.memory_space<vmem>>, vector<128x54xbf16>
    %cst_8 = arith.constant dense<0.000000e+00> : vector<2x54xf32>
    %10 = tpu.matmul %8, %9, %cst_8 {dimension_numbers = #tpu.dot_dimension_numbers<[1], [0], [0], [1], [0, 0, 1, 1], [], []>} : vector<2x128xbf16>, vector<128x54xbf16>, vector<2x54xf32> -> vector<2x54xf32>
    %c0_9 = arith.constant 0 : index
    %c0_10 = arith.constant 0 : index
    %11 = vector.load %arg5[%c0_9, %c0_10] : memref<1x54xf32, #tpu.memory_space<vmem>>, vector<1x54xf32>
    %12 = vector.broadcast %11 : vector<1x54xf32> to vector<2x54xf32>
    %13 = arith.addf %10, %12 : vector<2x54xf32>
    %cst_11 = arith.constant 0.000000e+00 : f32
    %14 = vector.broadcast %cst_11 : f32 to vector<2x54xf32>
    %15 = arith.maximumf %13, %14 : vector<2x54xf32>
    %16 = arith.truncf %15 : vector<2x54xf32> to vector<2x54xbf16>
    %c0_12 = arith.constant 0 : index
    %c0_13 = arith.constant 0 : index
    %17 = vector.load %arg6[%c0_12, %c0_13] : memref<54x10xbf16, #tpu.memory_space<vmem>>, vector<54x10xbf16>
    %cst_14 = arith.constant dense<0.000000e+00> : vector<2x10xf32>
    %18 = tpu.matmul %16, %17, %cst_14 {dimension_numbers = #tpu.dot_dimension_numbers<[1], [0], [0], [1], [0, 0, 1, 1], [], []>} : vector<2x54xbf16>, vector<54x10xbf16>, vector<2x10xf32> -> vector<2x10xf32>
    %c0_15 = arith.constant 0 : index
    %c0_16 = arith.constant 0 : index
    %19 = vector.load %arg7[%c0_15, %c0_16] : memref<1x10xf32, #tpu.memory_space<vmem>>, vector<1x10xf32>
    %20 = vector.broadcast %19 : vector<1x10xf32> to vector<2x10xf32>
    %21 = arith.addf %18, %20 : vector<2x10xf32>
    %c0_17 = arith.constant 0 : index
    %c0_18 = arith.constant 0 : index
    %22 = vector.load %arg8[%c0_17, %c0_18] : memref<2x10xf32, #tpu.memory_space<vmem>>, vector<2x10xf32>
    tpu.vector_store %arg8[%c0_17, %c0_18], %21 {strides = array<i32>} : memref<2x10xf32, #tpu.memory_space<vmem>>, vector<2x10xf32>,
    return
  }
  func.func @transform_0(%arg0: i32) -> (i32, i32) {
    %c0_i32 = arith.constant 0 : i32
    %c0_i32_0 = arith.constant 0 : i32
    return %arg0, %c0_i32 : i32, i32
  }
  func.func @transform_1(%arg0: i32) -> (i32, i32) {
    %c0_i32 = arith.constant 0 : i32
    %c0_i32_0 = arith.constant 0 : i32
    %c0_i32_1 = arith.constant 0 : i32
    return %c0_i32, %c0_i32_0 : i32, i32
  }
  func.func @transform_2(%arg0: i32) -> (i32, i32) {
    %c0_i32 = arith.constant 0 : i32
    %c0_i32_0 = arith.constant 0 : i32
    %c0_i32_1 = arith.constant 0 : i32
    return %c0_i32, %c0_i32_0 : i32, i32
  }
  func.func @transform_3(%arg0: i32) -> (i32, i32) {
    %c0_i32 = arith.constant 0 : i32
    %c0_i32_0 = arith.constant 0 : i32
    %c0_i32_1 = arith.constant 0 : i32
    return %c0_i32, %c0_i32_0 : i32, i32
  }
  func.func @transform_4(%arg0: i32) -> (i32, i32) {
    %c0_i32 = arith.constant 0 : i32
    %c0_i32_0 = arith.constant 0 : i32
    %c0_i32_1 = arith.constant 0 : i32
    return %c0_i32, %c0_i32_0 : i32, i32
  }
  func.func @transform_5(%arg0: i32) -> (i32, i32) {
    %c0_i32 = arith.constant 0 : i32
    %c0_i32_0 = arith.constant 0 : i32
    %c0_i32_1 = arith.constant 0 : i32
    return %c0_i32, %c0_i32_0 : i32, i32
  }
  func.func @transform_6(%arg0: i32) -> (i32, i32) {
    %c0_i32 = arith.constant 0 : i32
    %c0_i32_0 = arith.constant 0 : i32
    %c0_i32_1 = arith.constant 0 : i32
    return %c0_i32, %c0_i32_0 : i32, i32
  }
  func.func @transform_7(%arg0: i32) -> (i32, i32) {
    %c0_i32 = arith.constant 0 : i32
    %c0_i32_0 = arith.constant 0 : i32
    return %arg0, %c0_i32 : i32, i32
  }
}

</mosaic_0001>

<bundles_post_ra>
// kernel: net_forward.3
= control target key start
LH: loop header
LB: loop body
LE: loop exit
PB: predicated region body
PF: predicated region fallthrough
CT: control target
= control target key end

     0   :  { %vm64_vm0 = vcmask 1043456   ;;  %vm65_vm1 = vcmask 1044480   ;;  %v729_v1 = vmov 65535   ;;  %v730_v3 = vmov 0   ;;  %s910_s0 = inlined_call_operand.vmem [shape: bf16[4,25,392], index: 0, kind: input, shape index: {}]   ;;  %s911_s1 = inlined_call_operand.vmem [shape: bf16[6,25], index: 1, kind: input, shape index: {}]   ;;  %s912_s2 = inlined_call_operand.vmem [shape: f32[6,1], index: 2, kind: input, shape index: {}]   ;;  %s913_s3 = inlined_call_operand.vmem [shape: f32[6,392], index: 3, kind: output, shape index: {}]  }
   0x1   :  { %v681_v0 = vld [vmem:[%s910_s0 + $0x4] ss:$16 sps:$4 sm:$0xff]   ;;  %v66_v2 = vsel %vm64_vm0, 4294967295, %v729_v1  ;;  %112 = vmatprep.mubr.bf16.mxu0 %v730_v3  ;;  %153 = vmatprep.mubr.bf16.mxu1 %v730_v3  ;;  %v683_v4 = vld [vmem:[%s910_s0 + $0xc] ss:$16 sps:$4 sm:$0xff]   ;;  %vm60_vm2 = vcmask 203776  }
   0x2   :  { %680 = vset.pattern.permute.xlu0 %v730_v3  ;;  %80 = vmatprep.subr.bf16.mxu0 %v681_v0  ;;  %v685_v5 = vld [vmem:[%s910_s0] ss:$16 sps:$4 sm:$0xff]   ;;  %v686_v6 = vld [vmem:[%s910_s0 + $0x8] ss:$16 sps:$4 sm:$0xff]   ;;  %v766_v7 = vsel %vm65_vm1, %v66_v2, 0  ;;  %vm608_vm3 = vcmask 62464  }
   0x3   :  { %121 = vmatprep.subr.bf16.mxu1 %v683_v4  ;;  %v687_v8 = vld [vmem:[%s910_s0 + $0x24] ss:$16 sps:$4 sm:$0x1f]   ;;  %81 = vmatpush1.bf16.msra.mxu0 %v685_v5  ;;  %v689_v9 = vld [vmem:[%s910_s0 + $0x2c] ss:$16 sps:$4 sm:$0x1f]  }
   0x4   :  { %122 = vmatpush1.bf16.msra.mxu1 %v686_v6  ;;  %v72_v10 = vand.u32 %v687_v8, %v766_v7  ;;  %v691_v11 = vld [vmem:[%s910_s0 + $0x20] ss:$16 sps:$4 sm:$0x1f]   ;;  %v692_v12 = vld [vmem:[%s910_s0 + $0x28] ss:$16 sps:$4 sm:$0x1f]   ;;  %v78_v13 = vand.u32 %v689_v9, %v766_v7 }
   0x5   :  { %v69_v14 = vand.u32 %v691_v11, %v766_v7  ;;  %v75_v15 = vand.u32 %v692_v12, %v766_v7  ;;  %v787_v16 = vld [vmem:[%s911_s1] sm:$0x7]  ;;  %v695_v18 = vld [vmem:[%s910_s0 + $0x44] ss:$16 sps:$4 sm:$0xff]   ;;  %v696_v19 = vld [vmem:[%s910_s0 + $0x48] ss:$16 sps:$4 sm:$0xff]  }
   0x6   :  { %82 = vmatprep.subr.bf16.mxu0 %v72_v10  ;;  %v693_v17 = vld [vmem:[%s910_s0 + $0x40] ss:$16 sps:$4 sm:$0xff]   ;;  %123 = vmatprep.subr.bf16.mxu1 %v78_v13  ;;  %v698_v20 = vld [vmem:[%s910_s0 + $0x4c] ss:$16 sps:$4 sm:$0xff]   ;;  %v707_v29 = vld [vmem:[%s910_s0 + $0x84] ss:$16 sps:$4 sm:$0xff]  }
   0x7   :  { %83 = vmatpush1.bf16.msra.mxu0 %v69_v14  ;;  %v699_v21 = vld [vmem:[%s910_s0 + $0x60] ss:$16 sps:$4 sm:$0x1f]   ;;  %v701_v22 = vld [vmem:[%s910_s0 + $0x64] ss:$16 sps:$4 sm:$0x1f]  }
   0x8   :  { %124 = vmatpush1.bf16.msra.mxu1 %v75_v15  ;;  %219 = vmatprep.subr.bf16.mxu0 %v695_v18  ;;  %v702_v23 = vld [vmem:[%s910_s0 + $0x68] ss:$16 sps:$4 sm:$0x1f]   ;;  %v704_v24 = vld [vmem:[%s910_s0 + $0x6c] ss:$16 sps:$4 sm:$0x1f]   ;;  %v211_v25 = vand.u32 %v701_v22, %v766_v7  ;;  %v208_v27 = vand.u32 %v699_v21, %v766_v7 }
   0x9   :  { %260 = vmatprep.subr.bf16.mxu1 %v698_v20  ;;  %v217_v26 = vand.u32 %v704_v24, %v766_v7  ;;  %v214_v28 = vand.u32 %v702_v23, %v766_v7  ;;  %v710_v30 = vld [vmem:[%s910_s0 + $0x8c] ss:$16 sps:$4 sm:$0xff]   ;;  %v705_v31 = vld [vmem:[%s910_s0 + $0x80] ss:$16 sps:$4 sm:$0xff]   ;;  %v708_v32 = vld [vmem:[%s910_s0 + $0x88] ss:$16 sps:$4 sm:$0xff]  }
   0xa   :  { %622 = vmatmul.mubr.msk.bf16.vlgmr.msra.gmra.mrb[0].mxu0 %vm60_vm2, %v787_v16  ;;  %v711_v33 = vld [vmem:[%s910_s0 + $0xa0] ss:$16 sps:$4 sm:$0x1f]   ;;  %v713_v34 = vld [vmem:[%s910_s0 + $0xa4] ss:$16 sps:$4 sm:$0x1f]  }
   0xb   :  { %623 = vmatmul.mubr.msk.bf16.vlgmr.msra.gmra.mrb[0].mxu1 %vm60_vm2, %v787_v16  ;;  %220 = vmatpush1.bf16.msra.mxu0 %v693_v17  ;;  %v714_v35 = vld [vmem:[%s910_s0 + $0xa8] ss:$16 sps:$4 sm:$0x1f]   ;;  %v716_v36 = vld [vmem:[%s910_s0 + $0xac] ss:$16 sps:$4 sm:$0x1f]   ;;  %v354_v37 = vand.u32 %v713_v34, %v766_v7  ;;  %v351_v40 = vand.u32 %v711_v33, %v766_v7 }
   0xc   :  { %261 = vmatpush1.bf16.msra.mxu1 %v696_v19  ;;  %221 = vmatprep.subr.bf16.mxu0 %v211_v25  ;;  %v360_v38 = vand.u32 %v716_v36, %v766_v7  ;;  %v719_v39 = vld [vmem:[%s910_s0 + $0xc4] ss:$16 sps:$4 sm:$0xff]   ;;  %v357_v41 = vand.u32 %v714_v35, %v766_v7  ;;  %v722_v42 = vld [vmem:[%s910_s0 + $0xcc] ss:$16 sps:$4 sm:$0xff]   ;;  %v717_v46 = vld [vmem:[%s910_s0 + $0xc0] ss:$16 sps:$4 sm:$0xff]  }
   0xd   :  { %251 = vmatprep.mubr.bf16.mxu0 %v730_v3  ;;  %262 = vmatprep.subr.bf16.mxu1 %v217_v26  ;;  %v725_v43 = vld [vmem:[%s910_s0 + $0xe4] ss:$16 sps:$4 sm:$0x1f]   ;;  %v728_v44 = vld [vmem:[%s910_s0 + $0xec] ss:$16 sps:$4 sm:$0x1f]  }
   0xe   :  { %292 = vmatprep.mubr.bf16.mxu1 %v730_v3  ;;  %v591_v45 = vld [vmem:[%s912_s2] sm:$0x3f]  ;;  %v720_v47 = vld [vmem:[%s910_s0 + $0xc8] ss:$16 sps:$4 sm:$0xff]   ;;  %v497_v50 = vand.u32 %v725_v43, %v766_v7  ;;  %v503_v51 = vand.u32 %v728_v44, %v766_v7 }
   0xf   :  { %222 = vmatpush1.bf16.msra.mxu0 %v208_v27  ;;  %594 = vperm.xlu0 %680, %v591_v45   ;;  %v723_v48 = vld [vmem:[%s910_s0 + $0xe0] ss:$16 sps:$4 sm:$0x1f]   ;;  %v726_v49 = vld [vmem:[%s910_s0 + $0xe8] ss:$16 sps:$4 sm:$0x1f]  }
  0x10   :  { %263 = vmatpush1.bf16.msra.mxu1 %v214_v28  ;;  %362 = vmatprep.subr.bf16.mxu0 %v707_v29  ;;  %v494_v52 = vand.u32 %v723_v48, %v766_v7  ;;  %v500_v53 = vand.u32 %v726_v49, %v766_v7 }
  0x11   :  { %403 = vmatprep.subr.bf16.mxu1 %v710_v30 }
  0x12   :  { %640 = vmatmul.mubr.msk.bf16.vlgmr.msra.gmra.mrb[4].mxu0 %vm60_vm2, %v787_v16 }
  0x13   :  { %641 = vmatmul.mubr.msk.bf16.vlgmr.msra.gmra.mrb[4].mxu1 %vm60_vm2, %v787_v16  ;;  %363 = vmatpush1.bf16.msra.mxu0 %v705_v31 }
  0x14   :  { %404 = vmatpush1.bf16.msra.mxu1 %v708_v32  ;;  %364 = vmatprep.subr.bf16.mxu0 %v354_v37 }
  0x15   :  { %405 = vmatprep.subr.bf16.mxu1 %v360_v38  ;;  %394 = vmatprep.mubr.bf16.mxu0 %v730_v3 }
  0x16   :  { %435 = vmatprep.mubr.bf16.mxu1 %v730_v3 }
  0x17   :  { %365 = vmatpush1.bf16.msra.mxu0 %v351_v40 }
  0x18   :  { %406 = vmatpush1.bf16.msra.mxu1 %v357_v41  ;;  %505 = vmatprep.subr.bf16.mxu0 %v719_v39 }
  0x19   :  { %546 = vmatprep.subr.bf16.mxu1 %v722_v42 }
  0x1a   :  { %658 = vmatmul.mubr.msk.bf16.vlgmr.msra.gmra.mrb[8].mxu0 %vm60_vm2, %v787_v16 }
  0x1b   :  { %659 = vmatmul.mubr.msk.bf16.vlgmr.msra.gmra.mrb[8].mxu1 %vm60_vm2, %v787_v16  ;;  %506 = vmatpush1.bf16.msra.mxu0 %v717_v46 }
  0x1c   :  { %547 = vmatpush1.bf16.msra.mxu1 %v720_v47  ;;  %507 = vmatprep.subr.bf16.mxu0 %v497_v50 }
  0x1d   :  { %548 = vmatprep.subr.bf16.mxu1 %v503_v51  ;;  %537 = vmatprep.mubr.bf16.mxu0 %v730_v3 }
  0x1e   :  { %578 = vmatprep.mubr.bf16.mxu1 %v730_v3 }
  0x1f   :  { %508 = vmatpush1.bf16.msra.mxu0 %v494_v52 }
  0x20   :  { %549 = vmatpush1.bf16.msra.mxu1 %v500_v53 }
  0x22   :  { %676 = vmatmul.mubr.msk.bf16.vlgmr.msra.gmra.mrb[12].mxu0 %vm60_vm2, %v787_v16 }
  0x23   :  { %677 = vmatmul.mubr.msk.bf16.vlgmr.msra.gmra.mrb[12].mxu1 %vm60_vm2, %v787_v16 }
  0x8e   :  { %v595_v22 = vpop.permute.xlu0 %594 }
  0xdd   :  { %v114_v54 = vpop.f32.mrb[0].mxu0 }
  0xde   :  { %v155_v55 = vpop.f32.mrb[0].mxu1  ;;  %v116_v56 = vpop.f32.mrb[1].mxu0 }
  0xdf   :  { %v157_v57 = vpop.f32.mrb[1].mxu1  ;;  %v118_v58 = vpop.f32.mrb[2].mxu0 }
  0xe0   :  { %v159_v59 = vpop.f32.mrb[2].mxu1  ;;  %v119_v60 = vpop.f32.mrb[3].mxu0 }
  0xe1   :  { %v160_v61 = vpop.f32.mrb[3].mxu1 }
  0xe5   :  { %v253_v62 = vpop.f32.mrb[4].mxu0 }
  0xe6   :  { %v294_v63 = vpop.f32.mrb[4].mxu1  ;;  %v301_v0 = vmax.f32 %v114_v54, %v253_v62  ;;  %v255_v2 = vpop.f32.mrb[5].mxu0 }
  0xe7   :  { %v303_v1 = vmax.f32 %v155_v55, %v294_v63  ;;  %v296_v3 = vpop.f32.mrb[5].mxu1  ;;  %v302_v4 = vmax.f32 %v116_v56, %v255_v2  ;;  %v257_v6 = vpop.f32.mrb[6].mxu0 }
  0xe8   :  { %v304_v5 = vmax.f32 %v157_v57, %v296_v3  ;;  %v298_v7 = vpop.f32.mrb[6].mxu1  ;;  %v258_v8 = vpop.f32.mrb[7].mxu0 }
  0xe9   :  { %v299_v9 = vpop.f32.mrb[7].mxu1 }
  0xed   :  { %v396_v10 = vpop.f32.mrb[8].mxu0 }
  0xee   :  { %v437_v11 = vpop.f32.mrb[8].mxu1  ;;  %v444_v12 = vmax.f32 %v301_v0, %v396_v10  ;;  %v398_v14 = vpop.f32.mrb[9].mxu0 }
  0xef   :  { %v446_v13 = vmax.f32 %v303_v1, %v437_v11  ;;  %v439_v15 = vpop.f32.mrb[9].mxu1  ;;  %v445_v16 = vmax.f32 %v302_v4, %v398_v14  ;;  %v400_v18 = vpop.f32.mrb[10].mxu0 }
  0xf0   :  { %v447_v17 = vmax.f32 %v304_v5, %v439_v15  ;;  %v441_v19 = vpop.f32.mrb[10].mxu1  ;;  %v401_v20 = vpop.f32.mrb[11].mxu0 }
  0xf1   :  { %v442_v21 = vpop.f32.mrb[11].mxu1 }
  0xf5   :  { %v539_v23 = vpop.f32.mrb[12].mxu0 }
  0xf6   :  { %v580_v24 = vpop.f32.mrb[12].mxu1  ;;  %v587_v25 = vmax.f32 %v444_v12, %v539_v23  ;;  %v541_v27 = vpop.f32.mrb[13].mxu0 }
  0xf7   :  { %v589_v26 = vmax.f32 %v446_v13, %v580_v24  ;;  %v582_v28 = vpop.f32.mrb[13].mxu1  ;;  %v588_v29 = vmax.f32 %v445_v16, %v541_v27  ;;  %v543_v31 = vpop.f32.mrb[14].mxu0 }
  0xf8   :  { %v590_v30 = vmax.f32 %v447_v17, %v582_v28  ;;  %v584_v32 = vpop.f32.mrb[14].mxu1  ;;  %v597_v33 = vadd.f32 %v595_v22, %v587_v25  ;;  %v544_v35 = vpop.f32.mrb[15].mxu0 }
  0xf9   :  { %v599_v34 = vadd.f32 %v595_v22, %v589_v26  ;;  %v585_v36 = vpop.f32.mrb[15].mxu1  ;;  %v598_v37 = vadd.f32 %v595_v22, %v588_v29 }
  0xfa   :  { %v600_v38 = vadd.f32 %v595_v22, %v590_v30  ;;  %v601_v39 = vmax.f32 %v597_v33, 0.0 }
  0xfb   :  { %v603_v40 = vmax.f32 %v599_v34, 0.0  ;;  %v602_v41 = vmax.f32 %v598_v37, 0.0 }
  0xfc   :  { %v604_v42 = vmax.f32 %v600_v38, 0.0  ;;  %605 = vst [vmem:[%s913_s3] sm:$0x3f] %v601_v39 }
  0xfd   :  { %607 = vst [vmem:[%s913_s3 + $0x10] sm:$0x3f] %v603_v40  ;;  %606 = vst [vmem:[%s913_s3 + $0x8] sm:$0x3f] %v602_v41 }
  0xfe   :  { %609 = vst.msk [vmem:[%s913_s3 + $0x18] sm:$0x3f] %vm608_vm3, %v604_v42 }

// kernel: net_forward.4
= control target key start
LH: loop header
LB: loop body
LE: loop exit
PB: predicated region body
PF: predicated region fallthrough
CT: control target
= control target key end

     0   :  { %v691_v0 = vmov 0   ;;  %vm102_vm0 = vcmask 179200   ;;  %vm106_vm1 = vcmask 1042432   ;;  %vm536_vm2 = vcmask 408576   ;;  %s905_s0 = inlined_call_operand.vmem [shape: bf16[4,150,50], index: 0, kind: input, shape index: {}]   ;;  %s906_s1 = inlined_call_operand.vmem [shape: bf16[16,150], index: 1, kind: input, shape index: {}]   ;;  %s907_s2 = inlined_call_operand.vmem [shape: f32[16,1], index: 2, kind: input, shape index: {}]   ;;  %s908_s3 = inlined_call_operand.vmem [shape: f32[16,50], index: 3, kind: output, shape index: {}]  }
   0x1   :  { %110 = vmatprep.subr.bf16.mxu0 %v691_v0  ;;  %231 = vmatprep.subr.bf16.mxu1 %v691_v0  ;;  %v648_v1 = vld [vmem:[%s905_s0] sm:$0xff]   ;;  %v649_v2 = vld [vmem:[%s905_s0 + $0x4c] sm:$0xff]   ;;  %v651_v4 = vld [vmem:[%s905_s0 + $0x54] sm:$0xff]  }
   0x2   :  { %647 = vset.pattern.permute.xlu0 %v691_v0  ;;  %111 = vmatpush1.bf16.msra.mxu0 %v648_v1  ;;  %v650_v3 = vld [vmem:[%s905_s0 + $0x8] sm:$0xff]   ;;  %v652_v5 = vld [vmem:[%s905_s0 + $0x10] sm:$0xff]   ;;  %v653_v6 = vld [vmem:[%s905_s0 + $0x5c] sm:$0xff]  }
   0x3   :  { %232 = vmatpush1.bf16.msra.mxu1 %v649_v2  ;;  %112 = vmatprep.subr.bf16.mxu0 %v691_v0  ;;  %v654_v7 = vld [vmem:[%s905_s0 + $0x18] sm:$0xff]   ;;  %v655_v8 = vld [vmem:[%s905_s0 + $0x64] sm:$0xff]   ;;  %v657_v10 = vld [vmem:[%s905_s0 + $0x6c] sm:$0xff]  }
   0x4   :  { %233 = vmatprep.subr.bf16.mxu1 %v691_v0  ;;  %v656_v9 = vld [vmem:[%s905_s0 + $0x20] sm:$0xff]   ;;  %v658_v11 = vld [vmem:[%s905_s0 + $0x28] sm:$0xff]   ;;  %v659_v12 = vld [vmem:[%s905_s0 + $0x74] sm:$0xff]  }
   0x5   :  { %v668_v13 = vld [vmem:[%s906_s1 + $0x4] ss:$8 sps:$4 sm:$0xff]   ;;  %v660_v14 = vld [vmem:[%s905_s0 + $0x30] sm:$0xff]   ;;  %v661_v15 = vld [vmem:[%s905_s0 + $0x7c] sm:$0xff]  }
   0x6   :  { %113 = vmatpush1.bf16.msra.mxu0 %v650_v3  ;;  %555 = vmatprep.mubr.msk.bf16.mxu0 %vm102_vm0, %v668_v13  ;;  %v662_v16 = vld [vmem:[%s905_s0 + $0x38] sm:$0xff]   ;;  %v663_v17 = vld [vmem:[%s905_s0 + $0x84] sm:$0xff]   ;;  %v667_v20 = vld [vmem:[%s905_s0 + $0x94] ss:$0 sps:$4 sm:$0x77]  }
   0x7   :  { %234 = vmatpush1.bf16.msra.mxu1 %v651_v4  ;;  %114 = vmatprep.subr.bf16.mxu0 %v691_v0  ;;  %v666_v18 = vld [vmem:[%s905_s0 + $0x48] ss:$0 sps:$4 sm:$0x77]   ;;  %v664_v19 = vld [vmem:[%s905_s0 + $0x40] sm:$0xff]   ;;  %v665_v21 = vld [vmem:[%s905_s0 + $0x8c] sm:$0xff]   ;;  %v229_v23 = vsel %vm106_vm1, %v667_v20, 0 }
   0x8   :  { %235 = vmatprep.subr.bf16.mxu1 %v691_v0  ;;  %585 = vmatprep.mubr.msk.bf16.mxu1 %vm102_vm0, %v668_v13  ;;  %v108_v22 = vsel %vm106_vm1, %v666_v18, 0  ;;  %v803_v24 = vld [vmem:[%s906_s1] ss:$8 sps:$4 sm:$0xff]   ;;  %v671_v25 = vld [vmem:[%s905_s0 + $0x98] sm:$0xff]   ;;  %v674_v30 = vld [vmem:[%s905_s0 + $0xec] sm:$0xff]  }
   0x9   :  { %v672_v26 = vld [vmem:[%s905_s0 + $0xe4] sm:$0xff]   ;;  %v676_v32 = vld [vmem:[%s905_s0 + $0xf4] sm:$0xff]   ;;  %v678_v34 = vld [vmem:[%s905_s0 + $0xfc] sm:$0xff]  }
   0xa   :  { %115 = vmatpush1.bf16.msra.mxu0 %v652_v5  ;;  %v520_v27 = vld [vmem:[%s907_s2] sm:$0xff]  ;;  %v521_v29 = vld [vmem:[%s907_s2 + $0x8] sm:$0xff]  ;;  %v677_v33 = vld [vmem:[%s905_s0 + $0xb0] sm:$0xff]  }
   0xb   :  { %236 = vmatpush1.bf16.msra.mxu1 %v653_v6  ;;  %116 = vmatprep.subr.bf16.mxu0 %v691_v0  ;;  %v673_v28 = vld [vmem:[%s905_s0 + $0xa0] sm:$0xff]   ;;  %v675_v31 = vld [vmem:[%s905_s0 + $0xa8] sm:$0xff]   ;;  %v679_v35 = vld [vmem:[%s905_s0 + $0xb8] sm:$0xff]  }
   0xc   :  { %237 = vmatprep.subr.bf16.mxu1 %v691_v0  ;;  %524 = vperm.xlu0 %647, %v520_v27   ;;  %v680_v36 = vld [vmem:[%s905_s0 + $0x104] sm:$0xff]   ;;  %v682_v38 = vld [vmem:[%s905_s0 + $0x10c] sm:$0xff]   ;;  %v684_v40 = vld [vmem:[%s905_s0 + $0x114] sm:$0xff]  }
   0xd   :  { %v681_v37 = vld [vmem:[%s905_s0 + $0xc0] sm:$0xff]   ;;  %v683_v39 = vld [vmem:[%s905_s0 + $0xc8] sm:$0xff]   ;;  %v685_v41 = vld [vmem:[%s905_s0 + $0xd0] sm:$0xff]  }
   0xe   :  { %117 = vmatpush1.bf16.msra.mxu0 %v654_v7  ;;  %v686_v42 = vld [vmem:[%s905_s0 + $0x11c] sm:$0xff]   ;;  %v688_v44 = vld [vmem:[%s905_s0 + $0x124] sm:$0xff]   ;;  %v690_v46 = vld [vmem:[%s905_s0 + $0x12c] ss:$0 sps:$4 sm:$0x77]  }
   0xf   :  { %238 = vmatpush1.bf16.msra.mxu1 %v655_v8  ;;  %118 = vmatprep.subr.bf16.mxu0 %v691_v0  ;;  %v687_v43 = vld [vmem:[%s905_s0 + $0xd8] sm:$0xff]   ;;  %v689_v45 = vld [vmem:[%s905_s0 + $0xe0] ss:$0 sps:$4 sm:$0x77]   ;;  %v475_v48 = vsel %vm106_vm1, %v690_v46, 0 }
  0x10   :  { %239 = vmatprep.subr.bf16.mxu1 %v691_v0  ;;  %529 = vperm.xlu0 %647, %v521_v29   ;;  %v352_v47 = vsel %vm106_vm1, %v689_v45, 0 }
  0x12   :  { %119 = vmatpush1.bf16.msra.mxu0 %v656_v9 }
  0x13   :  { %240 = vmatpush1.bf16.msra.mxu1 %v657_v10  ;;  %120 = vmatprep.subr.bf16.mxu0 %v691_v0 }
  0x14   :  { %241 = vmatprep.subr.bf16.mxu1 %v691_v0 }
  0x16   :  { %121 = vmatpush1.bf16.msra.mxu0 %v658_v11 }
  0x17   :  { %242 = vmatpush1.bf16.msra.mxu1 %v659_v12  ;;  %122 = vmatprep.subr.bf16.mxu0 %v691_v0 }
  0x18   :  { %243 = vmatprep.subr.bf16.mxu1 %v691_v0 }
  0x1a   :  { %123 = vmatpush1.bf16.msra.mxu0 %v660_v14 }
  0x1b   :  { %244 = vmatpush1.bf16.msra.mxu1 %v661_v15  ;;  %124 = vmatprep.subr.bf16.mxu0 %v691_v0 }
  0x1c   :  { %245 = vmatprep.subr.bf16.mxu1 %v691_v0 }
  0x1e   :  { %125 = vmatpush1.bf16.msra.mxu0 %v662_v16 }
  0x1f   :  { %246 = vmatpush1.bf16.msra.mxu1 %v663_v17  ;;  %126 = vmatprep.subr.bf16.mxu0 %v691_v0 }
  0x20   :  { %247 = vmatprep.subr.bf16.mxu1 %v691_v0 }
  0x22   :  { %127 = vmatpush1.bf16.msra.mxu0 %v664_v19 }
  0x23   :  { %248 = vmatpush1.bf16.msra.mxu1 %v665_v21  ;;  %128 = vmatprep.subr.bf16.mxu0 %v691_v0 }
  0x24   :  { %249 = vmatprep.subr.bf16.mxu1 %v691_v0 }
  0x26   :  { %129 = vmatpush1.bf16.msra.mxu0 %v108_v22 }
  0x27   :  { %250 = vmatpush1.bf16.msra.mxu1 %v229_v23  ;;  %354 = vmatprep.subr.bf16.mxu0 %v691_v0 }
  0x28   :  { %477 = vmatprep.subr.bf16.mxu1 %v691_v0 }
  0x29   :  { %143 = vmatmul.mubr.bf16.vlgmr.msra.gmra.mrb[0].mxu0 %v803_v24 }
  0x2a   :  { %264 = vmatmul.mubr.bf16.vlgmr.msra.gmra.mrb[0].mxu1 %v803_v24  ;;  %355 = vmatpush1.bf16.msra.mxu0 %v671_v25 }
  0x2b   :  { %478 = vmatpush1.bf16.msra.mxu1 %v672_v26  ;;  %356 = vmatprep.subr.bf16.mxu0 %v691_v0 }
  0x2c   :  { %479 = vmatprep.subr.bf16.mxu1 %v691_v0  ;;  %615 = vmatprep.mubr.msk.bf16.mxu0 %vm102_vm0, %v668_v13 }
  0x2d   :  { %645 = vmatprep.mubr.msk.bf16.mxu1 %vm102_vm0, %v668_v13 }
  0x2e   :  { %357 = vmatpush1.bf16.msra.mxu0 %v673_v28 }
  0x2f   :  { %480 = vmatpush1.bf16.msra.mxu1 %v674_v30  ;;  %358 = vmatprep.subr.bf16.mxu0 %v691_v0 }
  0x30   :  { %481 = vmatprep.subr.bf16.mxu1 %v691_v0 }
  0x32   :  { %359 = vmatpush1.bf16.msra.mxu0 %v675_v31 }
  0x33   :  { %482 = vmatpush1.bf16.msra.mxu1 %v676_v32  ;;  %360 = vmatprep.subr.bf16.mxu0 %v691_v0 }
  0x34   :  { %483 = vmatprep.subr.bf16.mxu1 %v691_v0 }
  0x36   :  { %361 = vmatpush1.bf16.msra.mxu0 %v677_v33 }
  0x37   :  { %484 = vmatpush1.bf16.msra.mxu1 %v678_v34  ;;  %362 = vmatprep.subr.bf16.mxu0 %v691_v0 }
  0x38   :  { %485 = vmatprep.subr.bf16.mxu1 %v691_v0 }
  0x3a   :  { %363 = vmatpush1.bf16.msra.mxu0 %v679_v35 }
  0x3b   :  { %486 = vmatpush1.bf16.msra.mxu1 %v680_v36  ;;  %364 = vmatprep.subr.bf16.mxu0 %v691_v0 }
  0x3c   :  { %487 = vmatprep.subr.bf16.mxu1 %v691_v0 }
  0x3e   :  { %365 = vmatpush1.bf16.msra.mxu0 %v681_v37 }
  0x3f   :  { %488 = vmatpush1.bf16.msra.mxu1 %v682_v38  ;;  %366 = vmatprep.subr.bf16.mxu0 %v691_v0 }
  0x40   :  { %489 = vmatprep.subr.bf16.mxu1 %v691_v0 }
  0x42   :  { %367 = vmatpush1.bf16.msra.mxu0 %v683_v39 }
  0x43   :  { %490 = vmatpush1.bf16.msra.mxu1 %v684_v40  ;;  %368 = vmatprep.subr.bf16.mxu0 %v691_v0 }
  0x44   :  { %491 = vmatprep.subr.bf16.mxu1 %v691_v0 }
  0x46   :  { %369 = vmatpush1.bf16.msra.mxu0 %v685_v41 }
  0x47   :  { %492 = vmatpush1.bf16.msra.mxu1 %v686_v42  ;;  %370 = vmatprep.subr.bf16.mxu0 %v691_v0 }
  0x48   :  { %493 = vmatprep.subr.bf16.mxu1 %v691_v0 }
  0x4a   :  { %371 = vmatpush1.bf16.msra.mxu0 %v687_v43 }
  0x4b   :  { %494 = vmatpush1.bf16.msra.mxu1 %v688_v44  ;;  %372 = vmatprep.subr.bf16.mxu0 %v691_v0 }
  0x4c   :  { %495 = vmatprep.subr.bf16.mxu1 %v691_v0 }
  0x4e   :  { %373 = vmatpush1.bf16.msra.mxu0 %v352_v47 }
  0x4f   :  { %496 = vmatpush1.bf16.msra.mxu1 %v475_v48 }
  0x51   :  { %387 = vmatmul.mubr.bf16.vlgmr.msra.gmra.mrb[4].mxu0 %v803_v24 }
  0x52   :  { %510 = vmatmul.mubr.bf16.vlgmr.msra.gmra.mrb[4].mxu1 %v803_v24 }
  0x8b   :  { %v525_v59 = vpop.permute.xlu0 %524 }
  0x8f   :  { %v530_v9 = vpop.permute.xlu0 %529 }
  0xfc   :  { %v144_v49 = vpop.f32.mrb[0].mxu0 }
  0xfd   :  { %v265_v50 = vpop.f32.mrb[0].mxu1  ;;  %v146_v51 = vpop.f32.mrb[1].mxu0 }
  0xfe   :  { %v272_v52 = vmax.f32 %v144_v49, %v265_v50  ;;  %v267_v53 = vpop.f32.mrb[1].mxu1  ;;  %v147_v54 = vpop.f32.mrb[2].mxu0 }
  0xff   :  { %v268_v55 = vpop.f32.mrb[2].mxu1  ;;  %v149_v56 = vpop.f32.mrb[3].mxu0 }
 0x100   :  { %v273_v57 = vmax.f32 %v147_v54, %v268_v55  ;;  %v270_v58 = vpop.f32.mrb[3].mxu1 }
 0x124   :  { %v388_v60 = vpop.f32.mrb[4].mxu0 }
 0x125   :  { %v395_v61 = vmax.f32 %v272_v52, %v388_v60  ;;  %v511_v62 = vpop.f32.mrb[4].mxu1  ;;  %v390_v63 = vpop.f32.mrb[5].mxu0 }
 0x126   :  { %v513_v0 = vpop.f32.mrb[5].mxu1  ;;  %v391_v1 = vpop.f32.mrb[6].mxu0 }
 0x127   :  { %v518_v2 = vmax.f32 %v395_v61, %v511_v62  ;;  %v396_v3 = vmax.f32 %v273_v57, %v391_v1  ;;  %v514_v4 = vpop.f32.mrb[6].mxu1  ;;  %v393_v5 = vpop.f32.mrb[7].mxu0 }
 0x128   :  { %v516_v6 = vpop.f32.mrb[7].mxu1 }
 0x129   :  { %v532_v7 = vadd.f32 %v525_v59, %v518_v2  ;;  %v519_v8 = vmax.f32 %v396_v3, %v514_v4 }
 0x12b   :  { %v534_v10 = vmax.f32 %v532_v7, 0.0  ;;  %v533_v11 = vadd.f32 %v530_v9, %v519_v8 }
 0x12d   :  { %537 = vst.msk [vmem:[%s908_s3] sm:$0xff] %vm536_vm2, %v534_v10  ;;  %v535_v12 = vmax.f32 %v533_v11, 0.0 }
 0x12f   :  { %538 = vst.msk [vmem:[%s908_s3 + $0x8] sm:$0xff] %vm536_vm2, %v535_v12 }

// kernel: net_forward.5
= control target key start
LH: loop header
LB: loop body
LE: loop exit
PB: predicated region body
PF: predicated region fallthrough
CT: control target
= control target key end

     0   :  { %v739_v1 = vmov 0   ;;  %v98_v20 = vlaneseq  ;;  %v740_v25 = vmov 1966171168   ;;  %vm264_vm0 = vcmask 130048   ;;  %s928_s0 = inlined_call_operand.vmem [shape: bf16[2,400], index: 0, kind: input, shape index: {}]   ;;  %s929_s1 = inlined_call_operand.vmem [shape: bf16[400,128], index: 1, kind: input, shape index: {}]   ;;  %s930_s2 = inlined_call_operand.vmem [shape: f32[1,128], index: 2, kind: input, shape index: {}]   ;;  %s931_s3 = inlined_call_operand.vmem [shape: bf16[128,54], index: 3, kind: input, shape index: {}]   ;;  %s932_s4 = inlined_call_operand.vmem [shape: f32[1,54], index: 4, kind: input, shape index: {}]   ;;  %s933_s5 = inlined_call_operand.vmem [shape: bf16[54,10], index: 5, kind: input, shape index: {}]   ;;  %s934_s6 = inlined_call_operand.vmem [shape: f32[1,10], index: 6, kind: input, shape index: {}]   ;;  %s935_s7 = inlined_call_operand.hbm [shape: f32[2,10], index: 7, kind: output, shape index: {}]  }
   0x1   :  { %v678_v0 = vld [vmem:[%s929_s1 + $0x40] sm:$0xff]   ;;  %308 = vmatprep.subr.bf16.mxu1 %v739_v1  ;;  %v681_v4 = vld [vmem:[%s929_s1 + $0x48] sm:$0xff]   ;;  %v684_v7 = vld [vmem:[%s929_s1 + $0x50] sm:$0xff]   ;;  %v96_v26 = vunpack.c.l.s4 %v740_v25  ;;  %v741_v38 = vmov 0.0  }
   0x2   :  { %v679_v2 = vld [vmem:[%s929_s1 + $0x80] sm:$0xff]   ;;  %605 = vmatprep.subr.bf16.mxu0 %v678_v0  ;;  %v682_v5 = vld [vmem:[%s929_s1 + $0x88] sm:$0xff]   ;;  %v685_v8 = vld [vmem:[%s929_s1 + $0x90] sm:$0xff]   ;;  %v99_v27 = vshrl.u32 %v98_v20, 7 }
   0x3   :  { %v680_v3 = vld [vmem:[%s929_s1] sm:$0xff]   ;;  %309 = vmatpush1.bf16.msra.mxu1 %v679_v2  ;;  %v683_v6 = vld [vmem:[%s929_s1 + $0x8] sm:$0xff]   ;;  %v686_v9 = vld [vmem:[%s929_s1 + $0x10] sm:$0xff]   ;;  %v97_v30 = vunpack.c.0.s8 %v96_v26 }
   0x4   :  { %606 = vmatpush3.bf16.msra.mxu0 %v680_v3  ;;  %310 = vmatprep.subr.bf16.mxu1 %v739_v1  ;;  %v687_v10 = vld [vmem:[%s929_s1 + $0x58] sm:$0xff]   ;;  %v690_v13 = vld [vmem:[%s929_s1 + $0x60] sm:$0xff]   ;;  %v693_v16 = vld [vmem:[%s929_s1 + $0x68] sm:$0xff]  }
   0x5   :  { %607 = vmatprep.subr.bf16.mxu0 %v681_v4  ;;  %v688_v11 = vld [vmem:[%s929_s1 + $0x98] sm:$0xff]   ;;  %v691_v14 = vld [vmem:[%s929_s1 + $0xa0] sm:$0xff]   ;;  %v694_v17 = vld [vmem:[%s929_s1 + $0xa8] sm:$0xff]   ;;  %v100_v32 = vsub.s32 %v97_v30, %v99_v27 }
   0x6   :  { %v689_v12 = vld [vmem:[%s929_s1 + $0x18] sm:$0xff]   ;;  %v692_v15 = vld [vmem:[%s929_s1 + $0x20] sm:$0xff]   ;;  %v695_v18 = vld [vmem:[%s929_s1 + $0x28] sm:$0xff]  }
   0x7   :  { %311 = vmatpush1.bf16.msra.mxu1 %v682_v5  ;;  %v696_v19 = vld [vmem:[%s929_s1 + $0x70] sm:$0xff]   ;;  %v563_v23 = vld.sshfl [vmem:[%s928_s0] sm:$0x33 pattern:$0x75316420]  ;;  %v699_v24 = vld [vmem:[%s929_s1 + $0x78] sm:$0xff]  }
   0x8   :  { %608 = vmatpush3.bf16.msra.mxu0 %v683_v6  ;;  %312 = vmatprep.subr.bf16.mxu1 %v739_v1  ;;  %v697_v21 = vld [vmem:[%s929_s1 + $0xb0] sm:$0xff]   ;;  %v700_v28 = vld [vmem:[%s929_s1 + $0xb8] sm:$0xff]   ;;  %v94_v29 = vcombine.high %v563_v23, %v563_v23  ;;  %v702_v33 = vld [vmem:[%s929_s1 + $0xc0] sm:$0xff]   ;;  %v101_v36 = vrot.slane %v563_v23, %v100_v32 }
   0x9   :  { %609 = vmatprep.subr.bf16.mxu0 %v684_v7  ;;  %v698_v22 = vld [vmem:[%s929_s1 + $0x30] sm:$0xff]   ;;  %v701_v31 = vld [vmem:[%s929_s1 + $0x38] sm:$0xff]   ;;  %v703_v34 = vld [vmem:[%s931_s3] sm:$0xff]  }
   0xa   :  { %v108_v35 = vrot.slane %v94_v29, %v100_v32  ;;  %v109_v39 = vcombine.high %v101_v36, %v101_v36 }
   0xb   :  { %313 = vmatpush1.bf16.msra.mxu1 %v685_v8 }
   0xc   :  { %610 = vmatpush3.bf16.msra.mxu0 %v686_v9  ;;  %314 = vmatprep.subr.bf16.mxu1 %v739_v1  ;;  %v110_v37 = vcombine.high %v108_v35, %v108_v35 }
   0xd   :  { %611 = vmatprep.subr.bf16.mxu0 %v687_v10  ;;  %300 = vmatprep.mubr.bf16.mxu0 %v108_v35 }
   0xf   :  { %315 = vmatpush1.bf16.msra.mxu1 %v688_v11 }
  0x10   :  { %612 = vmatpush3.bf16.msra.mxu0 %v689_v12  ;;  %316 = vmatprep.subr.bf16.mxu1 %v739_v1 }
  0x11   :  { %613 = vmatprep.subr.bf16.mxu0 %v690_v13 }
  0x13   :  { %317 = vmatpush1.bf16.msra.mxu1 %v691_v14 }
  0x14   :  { %614 = vmatpush3.bf16.msra.mxu0 %v692_v15  ;;  %318 = vmatprep.subr.bf16.mxu1 %v739_v1 }
  0x15   :  { %615 = vmatprep.subr.bf16.mxu0 %v693_v16 }
  0x17   :  { %319 = vmatpush1.bf16.msra.mxu1 %v694_v17 }
  0x18   :  { %616 = vmatpush3.bf16.msra.mxu0 %v695_v18  ;;  %320 = vmatprep.subr.bf16.mxu1 %v739_v1 }
  0x19   :  { %617 = vmatprep.subr.bf16.mxu0 %v696_v19 }
  0x1b   :  { %321 = vmatpush1.bf16.msra.mxu1 %v697_v21 }
  0x1c   :  { %618 = vmatpush3.bf16.msra.mxu0 %v698_v22  ;;  %322 = vmatprep.subr.bf16.mxu1 %v739_v1 }
  0x1d   :  { %619 = vmatprep.subr.bf16.mxu0 %v699_v24 }
  0x1f   :  { %323 = vmatpush1.bf16.msra.mxu1 %v700_v28 }
  0x20   :  { %620 = vmatpush3.bf16.msra.mxu0 %v701_v31  ;;  %324 = vmatprep.subr.bf16.mxu1 %v739_v1 }
  0x21   :  { %641 = vmatprep.subr.bf16.mxu0 %v741_v38 }
  0x23   :  { %301 = vmatmul.mubr.bf16.vlgmr.msra.gmra.mrb[0].mxu0 %v101_v36  ;;  %325 = vmatpush1.bf16.msra.mxu1 %v702_v33 }
  0x24   :  { %12 = vsyncpa [#allocation3], 0  ;;  %589 = vmatprep.mubr.msk.bf16.mxu1 %vm264_vm0, %v110_v37  ;;  %642 = vmatpush3.bf16.msra.mxu0 %v703_v34  ;;  %v704_v40 = vld [vmem:[%s931_s3 + $0x8] sm:$0xff]   ;;  %v705_v41 = vld [vmem:[%s931_s3 + $0x10] sm:$0xff]   ;;  %vm742_vm1 = vmmov 0   ;;  %vm502_vm2 = vcmask 1042432  }
  0x25   :  { %643 = vmatprep.subr.bf16.mxu0 %v741_v38  ;;  %661 = vmatprep.subr.bf16.mxu1 %v741_v38  ;;  %v706_v42 = vld [vmem:[%s931_s3 + $0x18] sm:$0xff]   ;;  %v707_v43 = vld [vmem:[%s931_s3 + $0x20] sm:$0xff]   ;;  %v708_v44 = vld [vmem:[%s931_s3 + $0x28] sm:$0xff]   ;;  %vm498_vm3 = vcmask 441344   ;;  %vm546_vm4 = vcmask 74752  }
  0x26   :  { %341 = vmatmul.mubr.bf16.vlgmr.msra.gmra.mrb[0].mxu1 %v109_v39  ;;  %v709_v45 = vld [vmem:[%s931_s3 + $0x30] sm:$0xff]   ;;  %v710_v46 = vld [vmem:[%s931_s3 + $0x38] sm:$0xff]   ;;  %657 = vmatprep.mubr.msk.bf16.mxu0 %vm742_vm1, %v741_v38  ;;  %v711_v47 = vld [vmem:[%s933_s5] sm:$0xff]  }
  0x27   :  { %669 = vmatprep.mubr.msk.bf16.mxu1 %vm742_vm1, %v741_v38  ;;  %662 = vmatpush3.bf16.msra.mxu1 %v711_v47  ;;  %v712_v48 = vld [vmem:[%s933_s5 + $0x8] sm:$0xff]   ;;  %v562_v51 = vld [vmem:[%s930_s2] ss:$0 sm:$0xff]  ;;  %v713_v63 = vld [vmem:[%s933_s5 + $0x10] sm:$0xff]  }
  0x28   :  { %644 = vmatpush3.bf16.msra.mxu0 %v704_v40  ;;  %663 = vmatprep.subr.bf16.mxu1 %v741_v38  ;;  %v714_v0 = vld [vmem:[%s933_s5 + $0x18] ss:$0 sps:$4 sm:$0x77]   ;;  %v590_v2 = vld [vmem:[%s932_s4] ss:$0 sm:$0xff]  ;;  %s743_s5 = smov [#allocation2]  }
  0x29   :  { %645 = vmatprep.subr.bf16.mxu0 %v741_v38  ;;  %v504_v1 = vsel %vm502_vm2, %v714_v0, 0  ;;  %v599_v10 = vld [vmem:[%s934_s6] ss:$0 sm:$0xff]  ;;  %s554_s8 = sshll.u32 %s743_s5, 4  ;;  %s555_s8 = int_to_ptr.vmem [resolvable:$true] %s554_s8 }
  0x2a   :  { %s715_s4 = scalar_lea.vmem %s555_s8, 32  ;;  %p720_p1 = scmp.lt.s32.totalorder %s555_s8, %s555_s8 }
  0x2b   :  { %664 = vmatpush3.bf16.msra.mxu1 %v712_v48  ;;  %p716_p0 = scmp.ne.s32.totalorder %s555_s8, %s715_s4  ;;  %p721_p2 = scmp.lt.s32.totalorder %s715_s4, %s715_s4 }
  0x2c   :  { %646 = vmatpush3.bf16.msra.mxu0 %v705_v41  ;;  %665 = vmatprep.subr.bf16.mxu1 %v741_v38 }
  0x2d   :  { %647 = vmatprep.subr.bf16.mxu0 %v741_v38  ;;  %p722_p3 = por %p721_p2, %p720_p1 }
  0x2f   :  { %666 = vmatpush3.bf16.msra.mxu1 %v713_v63  ;;  %p723_p4 = pnand %p722_p3, %p716_p0 }
  0x30   :  { %648 = vmatpush3.bf16.msra.mxu0 %v706_v42  ;;  %667 = vmatprep.subr.bf16.mxu1 %v741_v38 }
  0x31   :  { %649 = vmatprep.subr.bf16.mxu0 %v741_v38 }
  0x33   :  { %668 = vmatpush3.bf16.msra.mxu1 %v504_v1 }
  0x34   :  { %650 = vmatpush3.bf16.msra.mxu0 %v707_v43 }
  0x35   :  { %651 = vmatprep.subr.bf16.mxu0 %v741_v38 }
  0x38   :  { %652 = vmatpush3.bf16.msra.mxu0 %v708_v44 }
  0x39   :  { %653 = vmatprep.subr.bf16.mxu0 %v741_v38 }
  0x3c   :  { %654 = vmatpush3.bf16.msra.mxu0 %v709_v45 }
  0x3d   :  { %655 = vmatprep.subr.bf16.mxu0 %v741_v38 }
  0x40   :  { %656 = vmatpush3.bf16.msra.mxu0 %v710_v46 }
  0xf6   :  { %v621_v49 = vpop.f32.mrb[0].mxu0 }
  0xf7   :  { %v622_v50 = vpop.f32.mrb[1].mxu0 }
  0xf8   :  { %v623_v52 = vadd.f32 %v622_v50, %v621_v49  ;;  %v624_v53 = vpop.f32.mrb[2].mxu0 }
  0xf9   :  { %v625_v54 = vpop.f32.mrb[3].mxu0  ;;  %v342_v55 = vpop.f32.mrb[0].mxu1 }
  0xfa   :  { %v303_v56 = vadd.f32 %v623_v52, %v562_v51  ;;  %v344_v57 = vpop.f32.mrb[1].mxu1 }
  0xfb   :  { %v345_v58 = vpop.f32.mrb[2].mxu1 }
  0xfc   :  { %v343_v59 = vadd.f32 %v342_v55, %v303_v56  ;;  %v346_v60 = vpop.f32.mrb[3].mxu1 }
  0xfe   :  { %v348_v61 = vmax.f32 %v343_v59, 0.0 }
 0x100   :  { %v349_v62 = vpack.c.bf16 %v348_v61, %v348_v61 }
 0x102   :  { %658 = vmatmul.mubr.bf16.vlgmr.msra.gmra.mrb[4].mxu0 %v349_v62 }
 0x1d5   :  { %v455_v3 = vpop.f32.mrb[4].mxu0 }
 0x1d6   :  { %v456_v4 = vadd.f32 %v590_v2, %v455_v3  ;;  %v659_v5 = vpop.f32.mrb[5].mxu0 }
 0x1d7   :  { %v458_v6 = vpop.f32.mrb[6].mxu0 }
 0x1d8   :  { %v461_v7 = vmax.f32 %v456_v4, 0.0  ;;  %v660_v8 = vpop.f32.mrb[7].mxu0 }
 0x1da   :  { %v462_v9 = vpack.c.bf16 %v461_v7, %v461_v7 }
 0x1dc   :  { %670 = vmatmul.mubr.msk.bf16.vlgmr.msra.gmra.mrb[4].mxu1 %vm498_vm3, %v462_v9 }
 0x2af   :  { %v540_v11 = vpop.f32.mrb[4].mxu1 }
 0x2b0   :  { %v541_v12 = vadd.f32 %v599_v10, %v540_v11  ;;  %v671_v13 = vpop.f32.mrb[5].mxu1 }
 0x2b1   :  { %v543_v14 = vpop.f32.mrb[6].mxu1 }
 0x2b2   :  { %v672_v15 = vpop.f32.mrb[7].mxu1  ;;  %547 = vst.msk [vmem:[#allocation2] sm:$0x3] %vm546_vm4, %v541_v12 }
 0x2b3   :  { %726 = shalt.err (!%p723_p4)
}
 0x2b4   :  { %s727_s6 = scalar_lea.hbm %s935_s7, 32 }
 0x2b5   :  { %p728_p5 = scmp.ne.s32.totalorder %s935_s7, %s727_s6  ;;  %p731_p6 = scmp.lt.u32.totalorder %s727_s6, %s935_s7 }
 0x2b7   :  { %p733_p7 = pnand %p731_p6, %p728_p5 }
 0x2b9   :  { %736 = shalt.err (!%p733_p7)
}
 0x2ba   :  { %557 = dma.vmem_to_hbm [thread:$0]  %s555_s8, 32, %s935_s7, [#allocation3]  }
 0x2bb   :  { %737 = dma.done.wait [#allocation3], 32  }
 0x2bc   :  { %738 = vsyncadd [#allocation3], 4294967264 }
 0x2bd   :  { %561 = vsyncpa [#allocation3], 1 }

</bundles_post_ra>
